<compile_context>
chip_gen: v5e
topology: v5e:2x2
jax: 0.10.0
libtpu: 0.0.40
codegen_flags: <defaults>
</compile_context>

<pallas_src>
import numpy as np

import jax
import jax.numpy as jnp
from jax.experimental import pallas as pl
from jax.experimental.pallas import tpu as pltpu


PACK = 8  # batch rows packed per sublane row; PACK*dd = 128 lanes for d=4


def _round_up(x, k):
    return (x + k - 1) // k * k


def make_noisenet_kernel(eps: float, half: int):
    def kernel(h_ref, w1_ref, b1_ref, w2_ref, bd_ref, cmat_ref, rmat_ref, out_ref):
        # ---- fc: Linear -> Tanh -> Linear (MXU matmuls, f32 accumulation) ----
        z = jnp.tanh(
            jnp.dot(h_ref[...], w1_ref[...], preferred_element_type=jnp.float32)
            + b1_ref[...])
        v = (jnp.dot(z, w2_ref[...], preferred_element_type=jnp.float32)
             + bd_ref[0:1, :])                                   # (rows, PACK*m)

        # ---- stable softplus(x)+eps on diagonal entries of the packed tril
        # vector, selected via a lane mask (single wide VPU/EUP pass).
        sp = jnp.maximum(v, 0.0) + jnp.log1p(jnp.exp(-jnp.abs(v))) + eps
        v_sp = jnp.where(bd_ref[1:2, :] > 0.0, sp, v)            # (rows, PACK*m)

        # ---- tril scatter fused with batched L @ L^T:
        #   p[:, :half]  = L[b, i, k]  at lane (b, k, i, j)   (A half)
        #   p[:, half:]  = L[b, j, k]  at lane (b, k, i, j)   (B half)
        # q = pA*pB is one full-width VPU multiply; the sum over k is a tiny
        # constant matmul on the MXU (no sub-vreg lane slicing).
        p = jnp.dot(v_sp, cmat_ref[...], preferred_element_type=jnp.float32)
        q = p[:, :half] * p[:, half:]                            # (rows, PACK*d*dd)
        out_ref[...] = jnp.dot(q, rmat_ref[...],
                               preferred_element_type=jnp.float32
                               ).astype(out_ref.dtype)           # (rows, PACK*dd)

    return kernel


def noisenet_forward(h, w1, b1, w2, b2, out_dim, eps=1e-3, max_rows_per_tile=128):
    """h: (B, hidden) in its native dtype. w1: (H, H), w2: (m, H) in PyTorch
    (out, in) layout. Returns (B, out_dim, out_dim) = L @ L^T."""
    B, H = h.shape
    d = out_dim
    m = d * (d + 1) // 2
    dd = d * d

    # ---------- structural constants (host numpy, built once) ----------
    tril = [(i, j) for i in range(d) for j in range(i + 1)]   # torch.tril_indices order
    tidx = {pos: t for t, pos in enumerate(tril)}

    a_pick = np.zeros((m, d * dd), np.float32)   # picks L[b, i, k] at out pos (i, j)
    b_pick = np.zeros((m, d * dd), np.float32)   # picks L[b, j, k] at out pos (i, j)
    for k in range(d):
        for i in range(d):
            for j in range(d):
                col = k * dd + i * d + j
                if k <= i:
                    a_pick[tidx[(i, k)], col] = 1.0
                if k <= j:
                    b_pick[tidx[(j, k)], col] = 1.0

    r_sum = np.zeros((d * dd, dd), np.float32)   # sums over k: out[e] = sum_k q[k*dd+e]
    for k in range(d):
        r_sum[k * dd + np.arange(dd), np.arange(dd)] = 1.0

    dmask = np.zeros((m,), np.float32)
    for t, (i, j) in enumerate(tril):
        if i == j:
            dmask[t] = 1.0

    # ---------- PACK-way block-diagonal packing (lane-dense layout) ----------
    eye_np = np.eye(PACK, dtype=np.float32)
    cmat = jnp.asarray(np.concatenate(
        [np.kron(eye_np, a_pick), np.kron(eye_np, b_pick)], axis=1))  # (PACK*m, 2*PACK*d*dd)
    rmat = jnp.asarray(np.kron(eye_np, r_sum))                        # (PACK*d*dd, PACK*dd)

    eye_j = jnp.asarray(eye_np)
    W1 = jnp.kron(eye_j, jnp.asarray(w1, jnp.float32).T)              # (PACK*H, PACK*H)
    W2 = jnp.kron(eye_j, jnp.asarray(w2, jnp.float32).T)              # (PACK*H, PACK*m)
    b1p = jnp.tile(jnp.asarray(b1, jnp.float32), PACK)[None, :]       # (1, PACK*H)
    bd = jnp.stack([jnp.tile(jnp.asarray(b2, jnp.float32), PACK),
                    jnp.tile(jnp.asarray(dmask), PACK)], axis=0)      # (2, PACK*m)

    # ---------- batch tiling: PACK rows per sublane row, grid over packed rows ----------
    rows = _round_up(B, PACK) // PACK
    trows = min(max_rows_per_tile, rows)        # 128 packed rows = 1024 batch rows / tile
    rows_p = _round_up(rows, trows)
    Bp = rows_p * PACK
    # zero-pad the batch, then a free row-major reshape packs 8 rows / sublane row
    h_packed = jnp.pad(h, ((0, Bp - B), (0, 0))).reshape(rows_p, PACK * H)

    half = PACK * d * dd
    kernel = make_noisenet_kernel(eps, half)
    grid = (rows_p // trows,)

    def const_spec(arr):
        return pl.BlockSpec(arr.shape, lambda i: (0, 0))   # VMEM-resident constants

    out_flat = pl.pallas_call(
        kernel,
        out_shape=jax.ShapeDtypeStruct((rows_p, PACK * dd), jnp.float32),
        grid=grid,
        in_specs=[
            pl.BlockSpec((trows, PACK * H), lambda i: (i, 0)),   # streamed, double-buffered
            const_spec(W1), const_spec(b1p), const_spec(W2),
            const_spec(bd), const_spec(cmat), const_spec(rmat),
        ],
        out_specs=pl.BlockSpec((trows, PACK * dd), lambda i: (i, 0)),  # lane-dense (…,128)
        compiler_params=pltpu.CompilerParams(
            dimension_semantics=("parallel",)),
    )(h_packed, W1, b1p, W2, bd, cmat, rmat)

    # row-major bytes of (rows_p, PACK*dd) == (Bp, dd); slice off padding, reshape free
    return out_flat.reshape(Bp, dd)[:B].reshape(B, d, d)


def noisenet_ref(h, w1, b1, w2, b2, out_dim, eps=1e-3):
    """Pure-JAX reference mirroring the PyTorch NoiseNet.forward."""
    d = out_dim
    Bsz = h.shape[0]
    v = jnp.tanh(h @ w1.T + b1) @ w2.T + b2                       # (B, m)

    tril = [(i, j) for i in range(d) for j in range(i + 1)]
    rows = jnp.array([i for i, _ in tril])
    cols = jnp.array([j for _, j in tril])

    L = jnp.zeros((Bsz, d, d), jnp.float32)
    L = L.at[:, rows, cols].set(v)
    diag = jnp.arange(d)
    L = L.at[:, diag, diag].set(jax.nn.softplus(L[:, diag, diag]) + eps)
    return L @ jnp.swapaxes(L, -1, -2)


if __name__ == "__main__":
    hidden_dim, out_dim = 32, 4
    m = out_dim * (out_dim + 1) // 2

    key = jax.random.PRNGKey(0)
    kh, k1, k2, k3, k4, kh2 = jax.random.split(key, 6)

    # PyTorch nn.Linear default init: U(-1/sqrt(fan_in), 1/sqrt(fan_in))
    bound1 = 1.0 / np.sqrt(hidden_dim)
    w1 = jax.random.uniform(k1, (hidden_dim, hidden_dim), jnp.float32, -bound1, bound1)
    b1 = jax.random.uniform(k2, (hidden_dim,), jnp.float32, -bound1, bound1)
    w2 = jax.random.uniform(k3, (m, hidden_dim), jnp.float32, -bound1, bound1)
    b2 = jax.random.uniform(k4, (m,), jnp.float32, -bound1, bound1)

    # ---- small-shape check (B=2, single grid step, full-array blocks) ----
    Bsz = 2
    h = jax.random.normal(kh, (Bsz, hidden_dim), dtype=jnp.float32)
    out_kernel = noisenet_forward(h, w1, b1, w2, b2, out_dim)
    jax.block_until_ready(out_kernel)
    out_ref = noisenet_ref(h, w1, b1, w2, b2, out_dim)
    assert out_kernel.shape == (Bsz, out_dim, out_dim)
    assert jnp.allclose(out_kernel, out_ref, atol=1e-5, rtol=1e-5), "mismatch vs reference (B=2)"
    assert jnp.allclose(out_kernel, jnp.swapaxes(out_kernel, -1, -2), atol=1e-5)

    # ---- larger batch exercising the grid, tail padding and pipelining ----
    B2 = 1037   # not a multiple of 8 nor of the tile -> exercises padding paths
    h2 = jax.random.normal(kh2, (B2, hidden_dim), dtype=jnp.float32)
    out_kernel2 = noisenet_forward(h2, w1, b1, w2, b2, out_dim)
    jax.block_until_ready(out_kernel2)
    out_ref2 = noisenet_ref(h2, w1, b1, w2, b2, out_dim)
    assert out_kernel2.shape == (B2, out_dim, out_dim)
    assert jnp.allclose(out_kernel2, out_ref2, atol=2e-5, rtol=2e-5), "mismatch vs reference (B=1037)"

    print("KERNEL_OK")
</pallas_src>

<mosaic_0001>
module attributes {stable_mosaic.version = 11 : i64} {
  func.func @kernel(%arg0: i32, %arg1: memref<1x256xf32, #tpu.memory_space<vmem>>, %arg2: memref<256x256xf32, #tpu.memory_space<vmem>>, %arg3: memref<1x256xf32, #tpu.memory_space<vmem>>, %arg4: memref<256x80xf32, #tpu.memory_space<vmem>>, %arg5: memref<2x80xf32, #tpu.memory_space<vmem>>, %arg6: memref<80x1024xf32, #tpu.memory_space<vmem>>, %arg7: memref<512x128xf32, #tpu.memory_space<vmem>>, %arg8: memref<1x128xf32, #tpu.memory_space<vmem>>) attributes {dimension_semantics = [#tpu.dimension_semantics<parallel>], iteration_bounds = array<i64: 1>, scalar_prefetch = 0 : i64, scratch_operands = 0 : i64, tpu.core_type = #tpu.core_type<tc>, window_params = [{transform_indices = @transform_0, window_bounds = array<i64: 1, 256>}, {pipeline_mode = #tpu.pipeline_mode<synchronous>, transform_indices = @transform_1, window_bounds = array<i64: 256, 256>}, {pipeline_mode = #tpu.pipeline_mode<synchronous>, transform_indices = @transform_2, window_bounds = array<i64: 1, 256>}, {pipeline_mode = #tpu.pipeline_mode<synchronous>, transform_indices = @transform_3, window_bounds = array<i64: 256, 80>}, {pipeline_mode = #tpu.pipeline_mode<synchronous>, transform_indices = @transform_4, window_bounds = array<i64: 2, 80>}, {pipeline_mode = #tpu.pipeline_mode<synchronous>, transform_indices = @transform_5, window_bounds = array<i64: 80, 1024>}, {pipeline_mode = #tpu.pipeline_mode<synchronous>, transform_indices = @transform_6, window_bounds = array<i64: 512, 128>}, {transform_indices = @transform_7, window_bounds = array<i64: 1, 128>}]} {
    %c0 = arith.constant 0 : index
    %c0_0 = arith.constant 0 : index
    %0 = vector.load %arg1[%c0, %c0_0] : memref<1x256xf32, #tpu.memory_space<vmem>>, vector<1x256xf32>
    %c0_1 = arith.constant 0 : index
    %c0_2 = arith.constant 0 : index
    %1 = vector.load %arg2[%c0_1, %c0_2] : memref<256x256xf32, #tpu.memory_space<vmem>>, vector<256x256xf32>
    %cst = arith.constant dense<0.000000e+00> : vector<1x256xf32>
    %2 = tpu.matmul %0, %1, %cst {dimension_numbers = #tpu.dot_dimension_numbers<[1], [0], [0], [1], [0, 0, 1, 1], [], []>} : vector<1x256xf32>, vector<256x256xf32>, vector<1x256xf32> -> vector<1x256xf32>
    %c0_3 = arith.constant 0 : index
    %c0_4 = arith.constant 0 : index
    %3 = vector.load %arg3[%c0_3, %c0_4] : memref<1x256xf32, #tpu.memory_space<vmem>>, vector<1x256xf32>
    %4 = arith.addf %2, %3 : vector<1x256xf32>
    %5 = math.tanh %4 : vector<1x256xf32>
    %c0_5 = arith.constant 0 : index
    %c0_6 = arith.constant 0 : index
    %6 = vector.load %arg4[%c0_5, %c0_6] : memref<256x80xf32, #tpu.memory_space<vmem>>, vector<256x80xf32>
    %cst_7 = arith.constant dense<0.000000e+00> : vector<1x80xf32>
    %7 = tpu.matmul %5, %6, %cst_7 {dimension_numbers = #tpu.dot_dimension_numbers<[1], [0], [0], [1], [0, 0, 1, 1], [], []>} : vector<1x256xf32>, vector<256x80xf32>, vector<1x80xf32> -> vector<1x80xf32>
    %c0_8 = arith.constant 0 : index
    %c0_9 = arith.constant 0 : index
    %8 = vector.load %arg5[%c0_8, %c0_9] : memref<2x80xf32, #tpu.memory_space<vmem>>, vector<1x80xf32>
    %9 = arith.addf %7, %8 : vector<1x80xf32>
    %cst_10 = arith.constant 0.000000e+00 : f32
    %10 = vector.broadcast %cst_10 : f32 to vector<1x80xf32>
    %11 = arith.maximumf %9, %10 : vector<1x80xf32>
    %12 = math.absf %9 : vector<1x80xf32>
    %cst_11 = arith.constant 0.000000e+00 : f32
    %13 = vector.broadcast %cst_11 : f32 to vector<1x80xf32>
    %14 = arith.subf %13, %12 : vector<1x80xf32>
    %15 = math.exp %14 : vector<1x80xf32>
    %16 = math.log1p %15 : vector<1x80xf32>
    %17 = arith.addf %11, %16 : vector<1x80xf32>
    %cst_12 = arith.constant 1.000000e-03 : f32
    %18 = vector.broadcast %cst_12 : f32 to vector<1x80xf32>
    %19 = arith.addf %17, %18 : vector<1x80xf32>
    %c1 = arith.constant 1 : index
    %c0_13 = arith.constant 0 : index
    %20 = vector.load %arg5[%c1, %c0_13] : memref<2x80xf32, #tpu.memory_space<vmem>>, vector<1x80xf32>
    %cst_14 = arith.constant 0.000000e+00 : f32
    %21 = vector.broadcast %cst_14 : f32 to vector<1x80xf32>
    %22 = arith.cmpf ogt, %20, %21 : vector<1x80xf32>
    %23 = arith.select %22, %19, %9 : vector<1x80xi1>, vector<1x80xf32>
    %c0_15 = arith.constant 0 : index
    %c0_16 = arith.constant 0 : index
    %24 = vector.load %arg6[%c0_15, %c0_16] : memref<80x1024xf32, #tpu.memory_space<vmem>>, vector<80x1024xf32>
    %cst_17 = arith.constant dense<0.000000e+00> : vector<1x1024xf32>
    %25 = tpu.matmul %23, %24, %cst_17 {dimension_numbers = #tpu.dot_dimension_numbers<[1], [0], [0], [1], [0, 0, 1, 1], [], []>} : vector<1x80xf32>, vector<80x1024xf32>, vector<1x1024xf32> -> vector<1x1024xf32>
    %26 = vector.extract_strided_slice %25 {offsets = [0, 0], sizes = [1, 512], strides = [1, 1]} : vector<1x1024xf32> to vector<1x512xf32>
    %27 = vector.extract_strided_slice %25 {offsets = [0, 512], sizes = [1, 512], strides = [1, 1]} : vector<1x1024xf32> to vector<1x512xf32>
    %28 = arith.mulf %26, %27 : vector<1x512xf32>
    %c0_18 = arith.constant 0 : index
    %c0_19 = arith.constant 0 : index
    %29 = vector.load %arg7[%c0_18, %c0_19] : memref<512x128xf32, #tpu.memory_space<vmem>>, vector<512x128xf32>
    %cst_20 = arith.constant dense<0.000000e+00> : vector<1x128xf32>
    %30 = tpu.matmul %28, %29, %cst_20 {dimension_numbers = #tpu.dot_dimension_numbers<[1], [0], [0], [1], [0, 0, 1, 1], [], []>} : vector<1x512xf32>, vector<512x128xf32>, vector<1x128xf32> -> vector<1x128xf32>
    %c0_21 = arith.constant 0 : index
    %c0_22 = arith.constant 0 : index
    %31 = vector.load %arg8[%c0_21, %c0_22] : memref<1x128xf32, #tpu.memory_space<vmem>>, vector<1x128xf32>
    tpu.vector_store %arg8[%c0_21, %c0_22], %30 {strides = array<i32>} : memref<1x128xf32, #tpu.memory_space<vmem>>, vector<1x128xf32>,
    return
  }
  func.func @transform_0(%arg0: i32) -> (i32, i32) {
    %c0_i32 = arith.constant 0 : i32
    %c0_i32_0 = arith.constant 0 : i32
    return %arg0, %c0_i32 : i32, i32
  }
  func.func @transform_1(%arg0: i32) -> (i32, i32) {
    %c0_i32 = arith.constant 0 : i32
    %c0_i32_0 = arith.constant 0 : i32
    %c0_i32_1 = arith.constant 0 : i32
    return %c0_i32, %c0_i32_0 : i32, i32
  }
  func.func @transform_2(%arg0: i32) -> (i32, i32) {
    %c0_i32 = arith.constant 0 : i32
    %c0_i32_0 = arith.constant 0 : i32
    %c0_i32_1 = arith.constant 0 : i32
    return %c0_i32, %c0_i32_0 : i32, i32
  }
  func.func @transform_3(%arg0: i32) -> (i32, i32) {
    %c0_i32 = arith.constant 0 : i32
    %c0_i32_0 = arith.constant 0 : i32
    %c0_i32_1 = arith.constant 0 : i32
    return %c0_i32, %c0_i32_0 : i32, i32
  }
  func.func @transform_4(%arg0: i32) -> (i32, i32) {
    %c0_i32 = arith.constant 0 : i32
    %c0_i32_0 = arith.constant 0 : i32
    %c0_i32_1 = arith.constant 0 : i32
    return %c0_i32, %c0_i32_0 : i32, i32
  }
  func.func @transform_5(%arg0: i32) -> (i32, i32) {
    %c0_i32 = arith.constant 0 : i32
    %c0_i32_0 = arith.constant 0 : i32
    %c0_i32_1 = arith.constant 0 : i32
    return %c0_i32, %c0_i32_0 : i32, i32
  }
  func.func @transform_6(%arg0: i32) -> (i32, i32) {
    %c0_i32 = arith.constant 0 : i32
    %c0_i32_0 = arith.constant 0 : i32
    %c0_i32_1 = arith.constant 0 : i32
    return %c0_i32, %c0_i32_0 : i32, i32
  }
  func.func @transform_7(%arg0: i32) -> (i32, i32) {
    %c0_i32 = arith.constant 0 : i32
    %c0_i32_0 = arith.constant 0 : i32
    return %arg0, %c0_i32 : i32, i32
  }
}

</mosaic_0001>

<bundles_post_ra>
// kernel: tpu_custom_call.1
= control target key start
LH: loop header
LB: loop body
LE: loop exit
PB: predicated region body
PF: predicated region fallthrough
CT: control target
= control target key end

     0   :  { %12 = vsyncpa [#allocation3], 0  ;;  %s1051_s0 = inlined_call_operand.vmem [shape: f32[1,256], index: 0, kind: input, shape index: {}]   ;;  %s1052_s1 = inlined_call_operand.hbm [shape: f32[256,256], index: 1, kind: input, shape index: {}]   ;;  %s1053_s2 = inlined_call_operand.vmem [shape: f32[1,256], index: 2, kind: input, shape index: {}]   ;;  %s1054_s3 = inlined_call_operand.vmem [shape: f32[256,80], index: 3, kind: input, shape index: {}]   ;;  %s1055_s4 = inlined_call_operand.vmem [shape: f32[2,80], index: 4, kind: input, shape index: {}]   ;;  %s1056_s5 = inlined_call_operand.hbm [shape: f32[80,1024], index: 5, kind: input, shape index: {}]   ;;  %s1057_s6 = inlined_call_operand.hbm [shape: f32[512,128], index: 6, kind: input, shape index: {}]   ;;  %s1058_s7 = inlined_call_operand.hbm [shape: f32[1,128], index: 7, kind: output, shape index: {}]  }
   0x1   :  { %13 = vsyncpa [#allocation6], 0  ;;  %s40_s26 = sshll.u32 %s1056_s5, 4  ;;  %s41_s26 = int_to_ptr.hbm [resolvable:$true] %s40_s26 }
   0x2   :  { %14 = vsyncpa [#allocation4], 0  ;;  %s863_s27 = smov [#allocation5]   ;;  %s21_s8 = sshll.u32 %s1052_s1, 4  ;;  %s22_s8 = int_to_ptr.hbm [resolvable:$true] %s21_s8 }
   0x3   :  { %s42_s28 = sshll.u32 %s863_s27, 4  ;;  %s864_s9 = smov 1024   ;;  %s43_s28 = int_to_ptr.vmem [resolvable:$true] %s42_s28 }
   0x4   :  { %s865_s10 = smov 64   ;;  %s866_s11 = smov [#allocation2]  }
   0x5   :  { %48 = dma.hbm_to_vmem [thread:$0]  %s41_s26, 10240, %s43_s28, [#allocation6], %s864_s9, %s864_s9, %s865_s10  }
   0x6   :  { %s23_s12 = sshll.u32 %s866_s11, 4  ;;  %s867_s13 = smov 256   ;;  %s24_s12 = int_to_ptr.vmem [resolvable:$true] %s23_s12 }
   0x7   :  { %s868_s14 = smov 16   ;;  %s53_s16 = sshll.u32 %s1057_s6, 4  ;;  %s54_s16 = int_to_ptr.hbm [resolvable:$true] %s53_s16 }
   0x8   :  { %29 = dma.hbm_to_vmem [thread:$0]  %s22_s8, 8192, %s24_s12, [#allocation3], %s867_s13, %s867_s13, %s868_s14  }
   0x9   :  { %s869_s17 = smov [#allocation7]   ;;  %s870_s19 = smov 128  }
   0xa   :  { %s55_s18 = sshll.u32 %s869_s17, 4  ;;  %s871_s1 = smov 8   ;;  %s56_s18 = int_to_ptr.vmem [resolvable:$true] %s55_s18 }
   0xb   :  { %61 = dma.hbm_to_vmem [thread:$0]  %s54_s16, 8192, %s56_s18, [#allocation6], %s870_s19, %s870_s19, %s871_s1  }
   0xc   :  { %857 = dma.done.wait [#allocation3], 8192  }
   0xd   :  { %858 = vsyncadd [#allocation3], 4294959104 }
   0xe   :  { %859 = dma.done.wait [#allocation6], 18432  }
   0xf   :  { %860 = vsyncadd [#allocation6], 4294948864  ;;  %v106_v0 = vld [vmem:[#allocation2 + $0xf8] sm:$0xff]  ;;  %v104_v1 = vld [vmem:[#allocation2 + $0xe8] sm:$0xff]  ;;  %vm404_vm2 = vcmask 654336   ;;  %s724_s14 = sshll.u32 %s1058_s7, 4  ;;  %s725_s14 = int_to_ptr.hbm [resolvable:$true] %s724_s14 }
  0x10   :  { %v138_v2 = vld [vmem:[#allocation2 + $0x1f8] sm:$0xff]  ;;  %190 = vmatpush.msra.mxu2 %v106_v0  ;;  %v105_v3 = vld [vmem:[#allocation2 + $0xf0] sm:$0xff]  ;;  %v136_v4 = vld [vmem:[#allocation2 + $0x1e8] sm:$0xff] }
  0x11   :  { %210 = vmatpush.msra.mxu3 %v138_v2  ;;  %150 = vmatpush.msra.mxu0 %v105_v3  ;;  %v102_v5 = vld [vmem:[#allocation2 + $0xd8] sm:$0xff]  ;;  %v103_v6 = vld [vmem:[#allocation2 + $0xe0] sm:$0xff]  ;;  %v137_v7 = vld [vmem:[#allocation2 + $0x1f0] sm:$0xff] }
  0x12   :  { %191 = vmatpush.msra.mxu2 %v104_v1  ;;  %v134_v8 = vld [vmem:[#allocation2 + $0x1d8] sm:$0xff]  ;;  %v101_v9 = vld [vmem:[#allocation2 + $0xd0] sm:$0xff]  ;;  %v135_v10 = vld [vmem:[#allocation2 + $0x1e0] sm:$0xff]  ;;  %170 = vmatpush.msra.mxu1 %v137_v7 }
  0x13   :  { %211 = vmatpush.msra.mxu3 %v136_v4  ;;  %151 = vmatpush.msra.mxu0 %v103_v6  ;;  %v100_v11 = vld [vmem:[#allocation2 + $0xc8] sm:$0xff]  ;;  %v99_v13 = vld [vmem:[#allocation2 + $0xc0] sm:$0xff]  ;;  %v133_v14 = vld [vmem:[#allocation2 + $0x1d0] sm:$0xff] }
  0x14   :  { %v132_v12 = vld [vmem:[#allocation2 + $0x1c8] sm:$0xff]  ;;  %192 = vmatpush.msra.mxu2 %v102_v5  ;;  %171 = vmatpush.msra.mxu1 %v135_v10  ;;  %v98_v15 = vld [vmem:[#allocation2 + $0xb8] sm:$0xff]  ;;  %v97_v17 = vld [vmem:[#allocation2 + $0xb0] sm:$0xff] }
  0x15   :  { %212 = vmatpush.msra.mxu3 %v134_v8  ;;  %152 = vmatpush.msra.mxu0 %v101_v9  ;;  %v130_v16 = vld [vmem:[#allocation2 + $0x1b8] sm:$0xff]  ;;  %v131_v18 = vld [vmem:[#allocation2 + $0x1c0] sm:$0xff]  ;;  %v96_v19 = vld [vmem:[#allocation2 + $0xa8] sm:$0xff] }
  0x16   :  { %193 = vmatpush.msra.mxu2 %v100_v11  ;;  %172 = vmatpush.msra.mxu1 %v133_v14  ;;  %v128_v20 = vld [vmem:[#allocation2 + $0x1a8] sm:$0xff]  ;;  %v95_v21 = vld [vmem:[#allocation2 + $0xa0] sm:$0xff]  ;;  %v129_v22 = vld [vmem:[#allocation2 + $0x1b0] sm:$0xff] }
  0x17   :  { %213 = vmatpush.msra.mxu3 %v132_v12  ;;  %153 = vmatpush.msra.mxu0 %v99_v13  ;;  %v94_v23 = vld [vmem:[#allocation2 + $0x98] sm:$0xff]  ;;  %v93_v25 = vld [vmem:[#allocation2 + $0x90] sm:$0xff]  ;;  %v127_v26 = vld [vmem:[#allocation2 + $0x1a0] sm:$0xff] }
  0x18   :  { %194 = vmatpush.msra.mxu2 %v98_v15  ;;  %173 = vmatpush.msra.mxu1 %v131_v18  ;;  %v126_v24 = vld [vmem:[#allocation2 + $0x198] sm:$0xff]  ;;  %v92_v27 = vld [vmem:[#allocation2 + $0x88] sm:$0xff]  ;;  %v91_v29 = vld [vmem:[#allocation2 + $0x80] sm:$0xff] }
  0x19   :  { %214 = vmatpush.msra.mxu3 %v130_v16  ;;  %154 = vmatpush.msra.mxu0 %v97_v17  ;;  %v124_v28 = vld [vmem:[#allocation2 + $0x188] sm:$0xff]  ;;  %v125_v30 = vld [vmem:[#allocation2 + $0x190] sm:$0xff]  ;;  %v90_v31 = vld [vmem:[#allocation2 + $0x78] sm:$0xff] }
  0x1a   :  { %195 = vmatpush.msra.mxu2 %v96_v19  ;;  %174 = vmatpush.msra.mxu1 %v129_v22  ;;  %v122_v32 = vld [vmem:[#allocation2 + $0x178] sm:$0xff]  ;;  %v89_v33 = vld [vmem:[#allocation2 + $0x70] sm:$0xff]  ;;  %v123_v34 = vld [vmem:[#allocation2 + $0x180] sm:$0xff] }
  0x1b   :  { %215 = vmatpush.msra.mxu3 %v128_v20  ;;  %155 = vmatpush.msra.mxu0 %v95_v21  ;;  %v88_v35 = vld [vmem:[#allocation2 + $0x68] sm:$0xff]  ;;  %v87_v37 = vld [vmem:[#allocation2 + $0x60] sm:$0xff]  ;;  %v121_v38 = vld [vmem:[#allocation2 + $0x170] sm:$0xff] }
  0x1c   :  { %196 = vmatpush.msra.mxu2 %v94_v23  ;;  %175 = vmatpush.msra.mxu1 %v127_v26  ;;  %v120_v36 = vld [vmem:[#allocation2 + $0x168] sm:$0xff]  ;;  %v86_v39 = vld [vmem:[#allocation2 + $0x58] sm:$0xff]  ;;  %v85_v41 = vld [vmem:[#allocation2 + $0x50] sm:$0xff] }
  0x1d   :  { %216 = vmatpush.msra.mxu3 %v126_v24  ;;  %156 = vmatpush.msra.mxu0 %v93_v25  ;;  %v118_v40 = vld [vmem:[#allocation2 + $0x158] sm:$0xff]  ;;  %v119_v42 = vld [vmem:[#allocation2 + $0x160] sm:$0xff]  ;;  %v84_v43 = vld [vmem:[#allocation2 + $0x48] sm:$0xff] }
  0x1e   :  { %197 = vmatpush.msra.mxu2 %v92_v27  ;;  %176 = vmatpush.msra.mxu1 %v125_v30  ;;  %v116_v44 = vld [vmem:[#allocation2 + $0x148] sm:$0xff]  ;;  %v83_v45 = vld [vmem:[#allocation2 + $0x40] sm:$0xff]  ;;  %v117_v46 = vld [vmem:[#allocation2 + $0x150] sm:$0xff] }
  0x1f   :  { %217 = vmatpush.msra.mxu3 %v124_v28  ;;  %157 = vmatpush.msra.mxu0 %v91_v29  ;;  %v82_v47 = vld [vmem:[#allocation2 + $0x38] sm:$0xff]  ;;  %v81_v49 = vld [vmem:[#allocation2 + $0x30] sm:$0xff]  ;;  %v115_v50 = vld [vmem:[#allocation2 + $0x140] sm:$0xff] }
  0x20   :  { %198 = vmatpush.msra.mxu2 %v90_v31  ;;  %177 = vmatpush.msra.mxu1 %v123_v34  ;;  %v114_v48 = vld [vmem:[#allocation2 + $0x138] sm:$0xff]  ;;  %v80_v51 = vld [vmem:[#allocation2 + $0x28] sm:$0xff]  ;;  %v79_v53 = vld [vmem:[#allocation2 + $0x20] sm:$0xff] }
  0x21   :  { %218 = vmatpush.msra.mxu3 %v122_v32  ;;  %158 = vmatpush.msra.mxu0 %v89_v33  ;;  %v112_v52 = vld [vmem:[#allocation2 + $0x128] sm:$0xff]  ;;  %v113_v54 = vld [vmem:[#allocation2 + $0x130] sm:$0xff]  ;;  %v74_v55 = vld [vmem:[%s1051_s0] sm:$0x3] }
  0x22   :  { %199 = vmatpush.msra.mxu2 %v88_v35  ;;  %178 = vmatpush.msra.mxu1 %v121_v38  ;;  %v78_v56 = vld [vmem:[#allocation2 + $0x18] sm:$0xff]  ;;  %v77_v58 = vld [vmem:[#allocation2 + $0x10] sm:$0xff]  ;;  %v111_v59 = vld [vmem:[#allocation2 + $0x120] sm:$0xff]  ;;  %v141_v61 = vperm.slane %v74_v55, 0  ;;  %v142_v63 = vperm.slane %v74_v55, 1 }
  0x23   :  { %219 = vmatpush.msra.mxu3 %v120_v36  ;;  %159 = vmatpush.msra.mxu0 %v87_v37  ;;  %v110_v57 = vld [vmem:[#allocation2 + $0x118] sm:$0xff]  ;;  %v76_v60 = vld [vmem:[#allocation2 + $0x8] sm:$0xff]  ;;  %v75_v0 = vld [vmem:[#allocation2] sm:$0xff] }
  0x24   :  { %200 = vmatpush.msra.mxu2 %v86_v39  ;;  %179 = vmatpush.msra.mxu1 %v119_v42  ;;  %v108_v62 = vld [vmem:[#allocation2 + $0x108] sm:$0xff]  ;;  %v109_v1 = vld [vmem:[#allocation2 + $0x110] sm:$0xff]  ;;  %v107_v2 = vld [vmem:[#allocation2 + $0x100] sm:$0xff] }
  0x25   :  { %220 = vmatpush.msra.mxu3 %v118_v40  ;;  %160 = vmatpush.msra.mxu0 %v85_v41  ;;  %v247_v3 = vld [vmem:[%s1054_s3 + $0x78] sm:$0xff]  ;;  %v246_v4 = vld [vmem:[%s1054_s3 + $0x70] sm:$0xff]  ;;  %v245_v6 = vld [vmem:[%s1054_s3 + $0x68] sm:$0xff] }
  0x26   :  { %201 = vmatpush.msra.mxu2 %v84_v43  ;;  %180 = vmatpush.msra.mxu1 %v117_v46  ;;  %v263_v5 = vld [vmem:[%s1054_s3 + $0xf8] sm:$0xff]  ;;  %v262_v7 = vld [vmem:[%s1054_s3 + $0xf0] sm:$0xff]  ;;  %v244_v8 = vld [vmem:[%s1054_s3 + $0x60] sm:$0xff] }
  0x27   :  { %221 = vmatpush.msra.mxu3 %v116_v44  ;;  %161 = vmatpush.msra.mxu0 %v83_v45  ;;  %v261_v9 = vld [vmem:[%s1054_s3 + $0xe8] sm:$0xff]  ;;  %v243_v10 = vld [vmem:[%s1054_s3 + $0x58] sm:$0xff]  ;;  %v260_v11 = vld [vmem:[%s1054_s3 + $0xe0] sm:$0xff] }
  0x28   :  { %202 = vmatpush.msra.mxu2 %v82_v47  ;;  %181 = vmatpush.msra.mxu1 %v115_v50  ;;  %v242_v12 = vld [vmem:[%s1054_s3 + $0x50] sm:$0xff]  ;;  %v259_v13 = vld [vmem:[%s1054_s3 + $0xd8] sm:$0xff]  ;;  %v241_v14 = vld [vmem:[%s1054_s3 + $0x48] sm:$0xff] }
  0x29   :  { %222 = vmatpush.msra.mxu3 %v114_v48  ;;  %162 = vmatpush.msra.mxu0 %v81_v49  ;;  %v258_v15 = vld [vmem:[%s1054_s3 + $0xd0] sm:$0xff]  ;;  %v240_v16 = vld [vmem:[%s1054_s3 + $0x40] sm:$0xff]  ;;  %v257_v17 = vld [vmem:[%s1054_s3 + $0xc8] sm:$0xff] }
  0x2a   :  { %203 = vmatpush.msra.mxu2 %v80_v51  ;;  %182 = vmatpush.msra.mxu1 %v113_v54  ;;  %v239_v18 = vld [vmem:[%s1054_s3 + $0x38] sm:$0xff]  ;;  %v256_v19 = vld [vmem:[%s1054_s3 + $0xc0] sm:$0xff]  ;;  %v238_v20 = vld [vmem:[%s1054_s3 + $0x30] sm:$0xff] }
  0x2b   :  { %223 = vmatpush.msra.mxu3 %v112_v52  ;;  %163 = vmatpush.msra.mxu0 %v79_v53  ;;  %v255_v21 = vld [vmem:[%s1054_s3 + $0xb8] sm:$0xff]  ;;  %v237_v22 = vld [vmem:[%s1054_s3 + $0x28] sm:$0xff]  ;;  %v254_v23 = vld [vmem:[%s1054_s3 + $0xb0] sm:$0xff] }
  0x2c   :  { %204 = vmatpush.msra.mxu2 %v78_v56  ;;  %183 = vmatpush.msra.mxu1 %v111_v59  ;;  %v236_v24 = vld [vmem:[%s1054_s3 + $0x20] sm:$0xff]  ;;  %v253_v25 = vld [vmem:[%s1054_s3 + $0xa8] sm:$0xff]  ;;  %v235_v26 = vld [vmem:[%s1054_s3 + $0x18] sm:$0xff] }
  0x2d   :  { %224 = vmatpush.msra.mxu3 %v110_v57  ;;  %164 = vmatpush.msra.mxu0 %v77_v58  ;;  %v252_v27 = vld [vmem:[%s1054_s3 + $0xa0] sm:$0xff]  ;;  %v234_v28 = vld [vmem:[%s1054_s3 + $0x10] sm:$0xff]  ;;  %v251_v29 = vld [vmem:[%s1054_s3 + $0x98] sm:$0xff] }
  0x2e   :  { %205 = vmatpush.msra.mxu2 %v76_v60  ;;  %184 = vmatpush.msra.mxu1 %v109_v1  ;;  %v233_v30 = vld [vmem:[%s1054_s3 + $0x8] sm:$0xff]  ;;  %v250_v31 = vld [vmem:[%s1054_s3 + $0x90] sm:$0xff]  ;;  %v232_v32 = vld [vmem:[%s1054_s3] sm:$0xff] }
  0x2f   :  { %225 = vmatpush.msra.mxu3 %v108_v62  ;;  %206 = vmatmul.f32.vlgmr.msra.gmra.mxu2 %v141_v61  ;;  %v249_v33 = vld [vmem:[%s1054_s3 + $0x88] sm:$0xff]  ;;  %v248_v34 = vld [vmem:[%s1054_s3 + $0x80] sm:$0xff] }
  0x30   :  { %226 = vmatmul.f32.vlgmr.msra.gmra.mxu3 %v142_v63  ;;  %165 = vmatpush.msra.mxu0 %v75_v0  ;;  %v396_v35 = vld [vmem:[#allocation5 + $0x240] sm:$0xff]  ;;  %v397_v36 = vld [vmem:[#allocation5 + $0x248] sm:$0xff] }
  0x31   :  { %166 = vmatmul.f32.vlgmr.msra.gmra.mxu0 %v141_v61  ;;  %185 = vmatpush.msra.mxu1 %v107_v2  ;;  %v388_v37 = vld [vmem:[#allocation5 + $0x200] sm:$0xff]  ;;  %v389_v38 = vld [vmem:[#allocation5 + $0x208] sm:$0xff] }
  0x32   :  { %265 = vmatpush.msrb.mxu0 %v247_v3  ;;  %186 = vmatmul.f32.vlgmr.msra.gmra.mxu1 %v142_v63  ;;  %v139_v39 = vld [vmem:[%s1053_s2] sm:$0x3]  ;;  %v381_v53 = vld [vmem:[#allocation5 + $0x1c8] sm:$0xff] }
  0x33   :  { %285 = vmatpush.msrb.mxu1 %v263_v5  ;;  %414 = vmatpush.msrb.mxu2 %v396_v35  ;;  %v146_v40 = vperm.slane %v139_v39, 0  ;;  %v147_v43 = vperm.slane %v139_v39, 1  ;;  %v380_v52 = vld [vmem:[#allocation5 + $0x1c0] sm:$0xff]  ;;  %v373_v55 = vld [vmem:[#allocation5 + $0x188] sm:$0xff]  ;;  %v399_v5 = vld [vmem:[#allocation5 + $0x258] sm:$0xff] }
  0x34   :  { %266 = vmatpush.msrb.mxu0 %v246_v4  ;;  %434 = vmatpush.msrb.mxu3 %v397_v36  ;;  %v372_v54 = vld [vmem:[#allocation5 + $0x180] sm:$0xff]  ;;  %v365_v57 = vld [vmem:[#allocation5 + $0x148] sm:$0xff]  ;;  %v398_v4 = vld [vmem:[#allocation5 + $0x250] sm:$0xff] }
  0x35   :  { %286 = vmatpush.msrb.mxu1 %v262_v7  ;;  %415 = vmatpush.msrb.mxu2 %v388_v37  ;;  %v364_v56 = vld [vmem:[#allocation5 + $0x140] sm:$0xff]  ;;  %v357_v59 = vld [vmem:[#allocation5 + $0x108] sm:$0xff]  ;;  %v334_v39 = vld [vmem:[#allocation5 + $0x50] sm:$0xff] }
  0x36   :  { %267 = vmatpush.msrb.mxu0 %v245_v6  ;;  %435 = vmatpush.msrb.mxu3 %v389_v38  ;;  %v356_v58 = vld [vmem:[#allocation5 + $0x100] sm:$0xff]  ;;  %v349_v61 = vld [vmem:[#allocation5 + $0xc8] sm:$0xff] }
  0x37   :  { %287 = vmatpush.msrb.mxu1 %v261_v9  ;;  %416 = vmatpush.msrb.mxu2 %v380_v52  ;;  %v348_v60 = vld [vmem:[#allocation5 + $0xc0] sm:$0xff]  ;;  %v341_v63 = vld [vmem:[#allocation5 + $0x88] sm:$0xff]  ;;  %v391_v9 = vld [vmem:[#allocation5 + $0x218] sm:$0xff] }
  0x38   :  { %268 = vmatpush.msrb.mxu0 %v244_v8  ;;  %436 = vmatpush.msrb.mxu3 %v381_v53  ;;  %v340_v62 = vld [vmem:[#allocation5 + $0x80] sm:$0xff]  ;;  %v333_v1 = vld [vmem:[#allocation5 + $0x48] sm:$0xff]  ;;  %v390_v8 = vld [vmem:[#allocation5 + $0x210] sm:$0xff] }
  0x39   :  { %288 = vmatpush.msrb.mxu1 %v260_v11  ;;  %417 = vmatpush.msrb.mxu2 %v372_v54  ;;  %v332_v0 = vld [vmem:[#allocation5 + $0x40] sm:$0xff]  ;;  %v325_v3 = vld [vmem:[#allocation5 + $0x8] sm:$0xff] }
  0x3a   :  { %269 = vmatpush.msrb.mxu0 %v243_v10  ;;  %437 = vmatpush.msrb.mxu3 %v373_v55  ;;  %v324_v2 = vld [vmem:[#allocation5] sm:$0xff]  ;;  %v401_v7 = vld [vmem:[#allocation5 + $0x268] sm:$0xff] }
  0x3b   :  { %289 = vmatpush.msrb.mxu1 %v259_v13  ;;  %418 = vmatpush.msrb.mxu2 %v364_v56  ;;  %v400_v6 = vld [vmem:[#allocation5 + $0x260] sm:$0xff]  ;;  %v393_v11 = vld [vmem:[#allocation5 + $0x228] sm:$0xff]  ;;  %v383_v13 = vld [vmem:[#allocation5 + $0x1d8] sm:$0xff] }
  0x3c   :  { %270 = vmatpush.msrb.mxu0 %v242_v12  ;;  %438 = vmatpush.msrb.mxu3 %v365_v57  ;;  %v392_v10 = vld [vmem:[#allocation5 + $0x220] sm:$0xff]  ;;  %v382_v12 = vld [vmem:[#allocation5 + $0x1d0] sm:$0xff]  ;;  %v345_v37 = vld [vmem:[#allocation5 + $0xa8] sm:$0xff] }
  0x3d   :  { %290 = vmatpush.msrb.mxu1 %v258_v15  ;;  %419 = vmatpush.msrb.mxu2 %v356_v58  ;;  %v385_v15 = vld [vmem:[#allocation5 + $0x1e8] sm:$0xff]  ;;  %v344_v35 = vld [vmem:[#allocation5 + $0xa0] sm:$0xff]  ;;  %v587_v57 = vld [vmem:[#allocation7 + $0x78] sm:$0xff] }
  0x3e   :  { %271 = vmatpush.msrb.mxu0 %v241_v14  ;;  %439 = vmatpush.msrb.mxu3 %v357_v59  ;;  %v384_v14 = vld [vmem:[#allocation5 + $0x1e0] sm:$0xff]  ;;  %v603_v58 = vld [vmem:[#allocation7 + $0xf8] sm:$0xff]  ;;  %v586_v59 = vld [vmem:[#allocation7 + $0x70] sm:$0xff] }
  0x3f   :  { %291 = vmatpush.msrb.mxu1 %v257_v17  ;;  %420 = vmatpush.msrb.mxu2 %v348_v60  ;;  %v375_v17 = vld [vmem:[#allocation5 + $0x198] sm:$0xff]  ;;  %v602_v60 = vld [vmem:[#allocation7 + $0xf0] sm:$0xff] }
  0x40   :  { %272 = vmatpush.msrb.mxu0 %v240_v16  ;;  %440 = vmatpush.msrb.mxu3 %v349_v61  ;;  %v374_v16 = vld [vmem:[#allocation5 + $0x190] sm:$0xff] }
  0x41   :  { %292 = vmatpush.msrb.mxu1 %v256_v19  ;;  %421 = vmatpush.msrb.mxu2 %v340_v62  ;;  %v377_v19 = vld [vmem:[#allocation5 + $0x1a8] sm:$0xff] }
  0x42   :  { %273 = vmatpush.msrb.mxu0 %v239_v18  ;;  %441 = vmatpush.msrb.mxu3 %v341_v63  ;;  %v376_v18 = vld [vmem:[#allocation5 + $0x1a0] sm:$0xff]  ;;  %v585_v62 = vld [vmem:[#allocation7 + $0x68] sm:$0xff] }
  0x43   :  { %293 = vmatpush.msrb.mxu1 %v255_v21  ;;  %422 = vmatpush.msrb.mxu2 %v332_v0  ;;  %v367_v21 = vld [vmem:[#allocation5 + $0x158] sm:$0xff]  ;;  %v601_v63 = vld [vmem:[#allocation7 + $0xe8] sm:$0xff] }
  0x44   :  { %274 = vmatpush.msrb.mxu0 %v238_v20  ;;  %442 = vmatpush.msrb.mxu3 %v333_v1  ;;  %v366_v20 = vld [vmem:[#allocation5 + $0x150] sm:$0xff] }
  0x45   :  { %294 = vmatpush.msrb.mxu1 %v254_v23  ;;  %423 = vmatpush.msrb.mxu2 %v324_v2  ;;  %v369_v23 = vld [vmem:[#allocation5 + $0x168] sm:$0xff]  ;;  %v321_v2 = vld [vmem:[%s1055_s4 + $0x1] sm:$0x1] }
  0x46   :  { %275 = vmatpush.msrb.mxu0 %v237_v22  ;;  %443 = vmatpush.msrb.mxu3 %v325_v3  ;;  %v368_v22 = vld [vmem:[#allocation5 + $0x160] sm:$0xff]  ;;  %vm322_vm1 = vcmp.gt.f32.partialorder %v321_v2, 0.0  ;;  %v613_v2 = vld [vmem:[#allocation7 + $0x148] sm:$0xff] }
  0x47   :  { %295 = vmatpush.msrb.mxu1 %v253_v25  ;;  %454 = vmatpush.msra.mxu2 %v398_v4  ;;  %v359_v25 = vld [vmem:[#allocation5 + $0x118] sm:$0xff]  ;;  %v584_v4 = vld [vmem:[#allocation7 + $0x60] sm:$0xff] }
  0x48   :  { %276 = vmatpush.msrb.mxu0 %v236_v24  ;;  %474 = vmatpush.msra.mxu3 %v399_v5  ;;  %v358_v24 = vld [vmem:[#allocation5 + $0x110] sm:$0xff]  ;;  %v600_v5 = vld [vmem:[#allocation7 + $0xe0] sm:$0xff] }
  0x49   :  { %296 = vmatpush.msrb.mxu1 %v252_v27  ;;  %455 = vmatpush.msra.mxu2 %v390_v8  ;;  %v361_v27 = vld [vmem:[#allocation5 + $0x128] sm:$0xff]  ;;  %v583_v8 = vld [vmem:[#allocation7 + $0x58] sm:$0xff] }
  0x4a   :  { %277 = vmatpush.msrb.mxu0 %v235_v26  ;;  %475 = vmatpush.msra.mxu3 %v391_v9  ;;  %v360_v26 = vld [vmem:[#allocation5 + $0x120] sm:$0xff]  ;;  %v599_v9 = vld [vmem:[#allocation7 + $0xd8] sm:$0xff] }
  0x4b   :  { %297 = vmatpush.msrb.mxu1 %v251_v29  ;;  %456 = vmatpush.msra.mxu2 %v382_v12  ;;  %v351_v29 = vld [vmem:[#allocation5 + $0xd8] sm:$0xff]  ;;  %v402_v12 = vld [vmem:[#allocation5 + $0x270] sm:$0xff] }
  0x4c   :  { %278 = vmatpush.msrb.mxu0 %v234_v28  ;;  %476 = vmatpush.msra.mxu3 %v383_v13  ;;  %v350_v28 = vld [vmem:[#allocation5 + $0xd0] sm:$0xff]  ;;  %v403_v13 = vld [vmem:[#allocation5 + $0x278] sm:$0xff] }
  0x4d   :  { %298 = vmatpush.msrb.mxu1 %v250_v31  ;;  %457 = vmatpush.msra.mxu2 %v374_v16  ;;  %v264_v31 = vld [vmem:[%s1055_s4] sm:$0x1]  ;;  %v394_v16 = vld [vmem:[#allocation5 + $0x230] sm:$0xff]  ;;  %s872_s4 = smov [#allocation8]  }
  0x4e   :  { %279 = vmatpush.msrb.mxu0 %v233_v30  ;;  %477 = vmatpush.msra.mxu3 %v375_v17  ;;  %v352_v30 = vld [vmem:[#allocation5 + $0xe0] sm:$0xff]  ;;  %v395_v17 = vld [vmem:[#allocation5 + $0x238] sm:$0xff]  ;;  %s722_s11 = sshll.u32 %s872_s4, 4  ;;  %s723_s11 = int_to_ptr.vmem [resolvable:$true] %s722_s11 }
  0x4f   :  { %299 = vmatpush.msrb.mxu1 %v249_v33  ;;  %458 = vmatpush.msra.mxu2 %v366_v20  ;;  %v342_v33 = vld [vmem:[#allocation5 + $0x90] sm:$0xff] }
  0x50   :  { %280 = vmatpush.msrb.mxu0 %v232_v32  ;;  %478 = vmatpush.msra.mxu3 %v367_v21  ;;  %v353_v32 = vld [vmem:[#allocation5 + $0xe8] sm:$0xff]  ;;  %v386_v20 = vld [vmem:[#allocation5 + $0x1f0] sm:$0xff]  ;;  %v387_v21 = vld [vmem:[#allocation5 + $0x1f8] sm:$0xff] }
  0x51   :  { %300 = vmatpush.msrb.mxu1 %v248_v34  ;;  %459 = vmatpush.msra.mxu2 %v358_v24  ;;  %v343_v34 = vld [vmem:[#allocation5 + $0x98] sm:$0xff]  ;;  %v378_v24 = vld [vmem:[#allocation5 + $0x1b0] sm:$0xff] }
  0x52   :  { %494 = vmatpush.msra.mxu0 %v400_v6  ;;  %479 = vmatpush.msra.mxu3 %v359_v25  ;;  %v379_v25 = vld [vmem:[#allocation5 + $0x1b8] sm:$0xff] }
  0x53   :  { %514 = vmatpush.msra.mxu1 %v401_v7  ;;  %460 = vmatpush.msra.mxu2 %v350_v28  ;;  %v579_v28 = vld [vmem:[#allocation7 + $0x38] sm:$0xff] }
  0x54   :  { %495 = vmatpush.msra.mxu0 %v392_v10  ;;  %480 = vmatpush.msra.mxu3 %v351_v29  ;;  %v595_v29 = vld [vmem:[#allocation7 + $0xb8] sm:$0xff] }
  0x55   :  { %515 = vmatpush.msra.mxu1 %v393_v11  ;;  %461 = vmatpush.msra.mxu2 %v342_v33  ;;  %v594_v33 = vld [vmem:[#allocation7 + $0xb0] sm:$0xff] }
  0x56   :  { %496 = vmatpush.msra.mxu0 %v384_v14  ;;  %481 = vmatpush.msra.mxu3 %v343_v34  ;;  %v582_v14 = vld [vmem:[#allocation7 + $0x50] sm:$0xff] }
  0x57   :  { %516 = vmatpush.msra.mxu1 %v385_v15  ;;  %462 = vmatpush.msra.mxu2 %v334_v39  ;;  %v598_v15 = vld [vmem:[#allocation7 + $0xd0] sm:$0xff]  ;;  %v347_v39 = vld [vmem:[#allocation5 + $0xb8] sm:$0xff] }
  0x58   :  { %497 = vmatpush.msra.mxu0 %v376_v18  ;;  %v581_v18 = vld [vmem:[#allocation7 + $0x48] sm:$0xff]  ;;  %v354_v34 = vld [vmem:[#allocation5 + $0xf0] sm:$0xff] }
  0x59   :  { %517 = vmatpush.msra.mxu1 %v377_v19  ;;  %v597_v19 = vld [vmem:[#allocation7 + $0xc8] sm:$0xff] }
  0x5a   :  { %498 = vmatpush.msra.mxu0 %v368_v22  ;;  %v580_v22 = vld [vmem:[#allocation7 + $0x40] sm:$0xff] }
  0x5b   :  { %518 = vmatpush.msra.mxu1 %v369_v23  ;;  %v596_v23 = vld [vmem:[#allocation7 + $0xc0] sm:$0xff] }
  0x5c   :  { %499 = vmatpush.msra.mxu0 %v360_v26  ;;  %v370_v26 = vld [vmem:[#allocation5 + $0x170] sm:$0xff] }
  0x5d   :  { %519 = vmatpush.msra.mxu1 %v361_v27  ;;  %v371_v27 = vld [vmem:[#allocation5 + $0x178] sm:$0xff] }
  0x5e   :  { %500 = vmatpush.msra.mxu0 %v352_v30  ;;  %v362_v30 = vld [vmem:[#allocation5 + $0x130] sm:$0xff] }
  0x5f   :  { %520 = vmatpush.msra.mxu1 %v353_v32  ;;  %v578_v32 = vld [vmem:[#allocation7 + $0x30] sm:$0xff] }
  0x60   :  { %501 = vmatpush.msra.mxu0 %v344_v35  ;;  %v355_v35 = vld [vmem:[#allocation5 + $0xf8] sm:$0xff] }
  0x61   :  { %521 = vmatpush.msra.mxu1 %v345_v37  ;;  %v593_v37 = vld [vmem:[#allocation7 + $0xa8] sm:$0xff] }
  0xae   :  { %v167_v41 = vpop.f32.mrf.mxu0 }
  0xaf   :  { %v168_v42 = vadd.f32 %v167_v41, %v146_v40  ;;  %v187_v44 = vpop.f32.mrf.mxu1  ;;  %v335_v40 = vld [vmem:[#allocation5 + $0x58] sm:$0xff]  ;;  %v336_v41 = vld [vmem:[#allocation5 + $0x60] sm:$0xff] }
  0xb0   :  { %482 = vmatpush.msra.mxu3 %v335_v40  ;;  %502 = vmatpush.msra.mxu0 %v336_v41  ;;  %v338_v40 = vld [vmem:[#allocation5 + $0x70] sm:$0xff]  ;;  %v339_v41 = vld [vmem:[#allocation5 + $0x78] sm:$0xff] }
  0xb1   :  { %v188_v45 = vadd.f32 %v187_v44, %v168_v42  ;;  %v337_v42 = vld [vmem:[#allocation5 + $0x68] sm:$0xff]  ;;  %v327_v44 = vld [vmem:[#allocation5 + $0x18] sm:$0xff] }
  0xb2   :  { %v207_v46 = vpop.f32.mrf.mxu2  ;;  %522 = vmatpush.msra.mxu1 %v337_v42  ;;  %483 = vmatpush.msra.mxu3 %v327_v44  ;;  %v330_v42 = vld [vmem:[#allocation5 + $0x30] sm:$0xff]  ;;  %v619_v44 = vld [vmem:[#allocation7 + $0x178] sm:$0xff] }
  0xb3   :  { %v227_v47 = vpop.f32.mrf.mxu3  ;;  %753 = vtanh.f32 %v188_v45  ;;  %v208_v48 = vadd.f32 %v207_v46, %v147_v43  ;;  %v326_v43 = vld [vmem:[#allocation5 + $0x10] sm:$0xff]  ;;  %v328_v45 = vld [vmem:[#allocation5 + $0x20] sm:$0xff] }
  0xb4   :  { %463 = vmatpush.msra.mxu2 %v326_v43  ;;  %503 = vmatpush.msra.mxu0 %v328_v45  ;;  %v331_v43 = vld [vmem:[#allocation5 + $0x38] sm:$0xff] }
  0xb5   :  { %v228_v49 = vadd.f32 %v227_v47, %v208_v48  ;;  %v329_v47 = vld [vmem:[#allocation5 + $0x28] sm:$0xff]  ;;  %v635_v45 = vld [vmem:[#allocation7 + $0x1f8] sm:$0xff] }
  0xb6   :  { %523 = vmatpush.msra.mxu1 %v329_v47  ;;  %v634_v47 = vld [vmem:[#allocation7 + $0x1f0] sm:$0xff] }
  0xb7   :  { %755 = vtanh.f32 %v228_v49 }
  0xb9   :  { %v754_v50 = vpop.eup %753 }
  0xba   :  { %281 = vmatmul.f32.vlgmr.msrb.gmra.mxu0 %v754_v50 }
  0xbb   :  { %636 = vmatpush.msrb.mxu0 %v587_v57  ;;  %v590_v57 = vld [vmem:[#allocation7 + $0x90] sm:$0xff] }
  0xbd   :  { %v756_v51 = vpop.eup %755  ;;  %637 = vmatpush.msrb.mxu0 %v586_v59  ;;  %v631_v59 = vld [vmem:[#allocation7 + $0x1d8] sm:$0xff] }
  0xbe   :  { %301 = vmatmul.f32.vlgmr.msrb.gmra.mxu1 %v756_v51 }
  0xbf   :  { %656 = vmatpush.msrb.mxu1 %v603_v58  ;;  %638 = vmatpush.msrb.mxu0 %v585_v62  ;;  %v615_v58 = vld [vmem:[#allocation7 + $0x158] sm:$0xff]  ;;  %v614_v62 = vld [vmem:[#allocation7 + $0x150] sm:$0xff] }
  0xc1   :  { %657 = vmatpush.msrb.mxu1 %v602_v60  ;;  %639 = vmatpush.msrb.mxu0 %v584_v4  ;;  %v573_v60 = vld [vmem:[#allocation7 + $0x8] sm:$0xff]  ;;  %v612_v4 = vld [vmem:[#allocation7 + $0x140] sm:$0xff] }
  0xc3   :  { %658 = vmatpush.msrb.mxu1 %v601_v63  ;;  %640 = vmatpush.msrb.mxu0 %v583_v8  ;;  %v630_v63 = vld [vmem:[#allocation7 + $0x1d0] sm:$0xff] }
  0xc4   :  { %v610_v8 = vld [vmem:[#allocation7 + $0x130] sm:$0xff] }
  0xc5   :  { %659 = vmatpush.msrb.mxu1 %v600_v5  ;;  %641 = vmatpush.msrb.mxu0 %v582_v14  ;;  %v628_v5 = vld [vmem:[#allocation7 + $0x1c0] sm:$0xff]  ;;  %v607_v14 = vld [vmem:[#allocation7 + $0x118] sm:$0xff] }
  0xc7   :  { %660 = vmatpush.msrb.mxu1 %v599_v9  ;;  %642 = vmatpush.msrb.mxu0 %v581_v18  ;;  %v626_v9 = vld [vmem:[#allocation7 + $0x1b0] sm:$0xff]  ;;  %v605_v18 = vld [vmem:[#allocation7 + $0x108] sm:$0xff] }
  0xc9   :  { %661 = vmatpush.msrb.mxu1 %v598_v15  ;;  %643 = vmatpush.msrb.mxu0 %v580_v22  ;;  %v623_v15 = vld [vmem:[#allocation7 + $0x198] sm:$0xff] }
  0xcb   :  { %662 = vmatpush.msrb.mxu1 %v597_v19  ;;  %644 = vmatpush.msrb.mxu0 %v579_v28  ;;  %v621_v19 = vld [vmem:[#allocation7 + $0x188] sm:$0xff] }
  0xcd   :  { %663 = vmatpush.msrb.mxu1 %v596_v23  ;;  %645 = vmatpush.msrb.mxu0 %v578_v32 }
  0xcf   :  { %664 = vmatpush.msrb.mxu1 %v595_v29 }
  0xd1   :  { %665 = vmatpush.msrb.mxu1 %v594_v33 }
  0xd3   :  { %666 = vmatpush.msrb.mxu1 %v593_v37 }
 0x137   :  { %v282_v36 = vpop.f32.mrf.mxu0 }
 0x138   :  { %v283_v38 = vadd.f32 %v282_v36, %v264_v31  ;;  %v363_v31 = vld [vmem:[#allocation5 + $0x138] sm:$0xff]  ;;  %v577_v36 = vld [vmem:[#allocation7 + $0x28] sm:$0xff] }
 0x139   :  { %646 = vmatpush.msrb.mxu0 %v577_v36 }
 0x13b   :  { %v302_v46 = vpop.f32.mrf.mxu1 }
 0x13c   :  { %v303_v48 = vadd.f32 %v302_v46, %v283_v38  ;;  %v346_v38 = vld [vmem:[#allocation5 + $0xb0] sm:$0xff] }
 0x13d   :  { %v618_v46 = vld [vmem:[#allocation7 + $0x170] sm:$0xff] }
 0x13e   :  { %v306_v49 = vand.u32 2147483647, %v303_v48  ;;  %v305_v3 = vmax.f32 %v303_v48, 0.0 }
 0x140   :  { %v307_v50 = vsub.f32 0.0, %v306_v49  ;;  %v592_v49 = vld [vmem:[#allocation7 + $0xa0] sm:$0xff] }
 0x141   :  { %667 = vmatpush.msrb.mxu1 %v592_v49 }
 0x142   :  { %v308_v51 = vmul.f32 1.442695, %v307_v50  ;;  %v617_v50 = vld [vmem:[#allocation7 + $0x168] sm:$0xff] }
 0x144   :  { %757 = vpow2.f32 %v308_v51  ;;  %v633_v51 = vld [vmem:[#allocation7 + $0x1e8] sm:$0xff] }
 0x14a   :  { %v758_v52 = vpop.eup %757 }
 0x14b   :  { %v310_v53 = vadd.f32 1.0, %v758_v52  ;;  %v313_v54 = vmul.f32 -0.5, %v758_v52  ;;  %v316_v56 = vand.u32 2147483647, %v758_v52 }
 0x14d   :  { %759 = vlog2.f32 %v310_v53  ;;  %v314_v55 = vadd.f32 1.0, %v313_v54  ;;  %vm317_vm0 = vcmp.lt.f32.partialorder %v316_v56, 0.0004427343  ;;  %v591_v53 = vld [vmem:[#allocation7 + $0x98] sm:$0xff]  ;;  %v616_v54 = vld [vmem:[#allocation7 + $0x160] sm:$0xff]  ;;  %v574_v56 = vld [vmem:[#allocation7 + $0x10] sm:$0xff] }
 0x14e   :  { %668 = vmatpush.msrb.mxu1 %v591_v53 }
 0x14f   :  { %v315_v1 = vmul.f32 %v758_v52, %v314_v55  ;;  %v575_v52 = vld [vmem:[#allocation7 + $0x18] sm:$0xff]  ;;  %v632_v55 = vld [vmem:[#allocation7 + $0x1e0] sm:$0xff] }
 0x150   :  { %669 = vmatpush.msrb.mxu1 %v590_v57 }
 0x153   :  { %v760_v61 = vpop.eup %759 }
 0x154   :  { %v312_v0 = vmul.f32 0.6931472, %v760_v61  ;;  %v589_v61 = vld [vmem:[#allocation7 + $0x88] sm:$0xff] }
 0x155   :  { %670 = vmatpush.msrb.mxu1 %v589_v61 }
 0x156   :  { %v318_v6 = vsel %vm317_vm0, %v315_v1, %v312_v0  ;;  %v572_v0 = vld [vmem:[#allocation7] sm:$0xff] }
 0x157   :  { %v319_v7 = vadd.f32 %v318_v6, %v305_v3  ;;  %v588_v1 = vld [vmem:[#allocation7 + $0x80] sm:$0xff]  ;;  %v629_v3 = vld [vmem:[#allocation7 + $0x1c8] sm:$0xff]  ;;  %v611_v6 = vld [vmem:[#allocation7 + $0x138] sm:$0xff] }
 0x158   :  { %671 = vmatpush.msrb.mxu1 %v588_v1 }
 0x159   :  { %v320_v10 = vadd.f32 0.001, %v319_v7  ;;  %v627_v7 = vld [vmem:[#allocation7 + $0x1b8] sm:$0xff] }
 0x15b   :  { %v1030_v11 = vsel %vm322_vm1, %v320_v10, %v303_v48  ;;  %v576_v48 = vld [vmem:[#allocation7 + $0x20] sm:$0xff]  ;;  %v609_v10 = vld [vmem:[#allocation7 + $0x128] sm:$0xff] }
 0x15c   :  { %735 = vmatmul.msk.f32.vlgmr.msrb.gmra.mxu2 %vm404_vm2, %v1030_v11  ;;  %736 = vmatmul.msk.f32.vlgmr.msrb.gmra.mxu3 %vm404_vm2, %v1030_v11 }
 0x15d   :  { %739 = vmatmul.msk.f32.vlgmr.msra.gmra.mxu0 %vm404_vm2, %v1030_v11  ;;  %740 = vmatmul.msk.f32.vlgmr.msra.gmra.mxu1 %vm404_vm2, %v1030_v11 }
 0x15e   :  { %534 = vmatpush.msrb.mxu2 %v402_v12  ;;  %554 = vmatpush.msrb.mxu3 %v403_v13  ;;  %v608_v12 = vld [vmem:[#allocation7 + $0x120] sm:$0xff] }
 0x15f   :  { %647 = vmatpush.msrb.mxu0 %v576_v48  ;;  %v624_v13 = vld [vmem:[#allocation7 + $0x1a0] sm:$0xff] }
 0x160   :  { %535 = vmatpush.msrb.mxu2 %v394_v16  ;;  %555 = vmatpush.msrb.mxu3 %v395_v17  ;;  %v606_v16 = vld [vmem:[#allocation7 + $0x110] sm:$0xff] }
 0x161   :  { %648 = vmatpush.msrb.mxu0 %v575_v52  ;;  %v622_v17 = vld [vmem:[#allocation7 + $0x190] sm:$0xff] }
 0x162   :  { %536 = vmatpush.msrb.mxu2 %v386_v20  ;;  %556 = vmatpush.msrb.mxu3 %v387_v21  ;;  %v604_v20 = vld [vmem:[#allocation7 + $0x100] sm:$0xff] }
 0x163   :  { %649 = vmatpush.msrb.mxu0 %v574_v56  ;;  %v620_v21 = vld [vmem:[#allocation7 + $0x180] sm:$0xff] }
 0x164   :  { %537 = vmatpush.msrb.mxu2 %v378_v24  ;;  %557 = vmatpush.msrb.mxu3 %v379_v25 }
 0x165   :  { %737 = vmatmul.msk.f32.vlgmr.msra.gmra.mxu2 %vm404_vm2, %v1030_v11  ;;  %738 = vmatmul.msk.f32.vlgmr.msra.gmra.mxu3 %vm404_vm2, %v1030_v11 }
 0x166   :  { %538 = vmatpush.msrb.mxu2 %v370_v26  ;;  %558 = vmatpush.msrb.mxu3 %v371_v27 }
 0x167   :  { %650 = vmatpush.msrb.mxu0 %v573_v60 }
 0x168   :  { %539 = vmatpush.msrb.mxu2 %v362_v30  ;;  %559 = vmatpush.msrb.mxu3 %v363_v31 }
 0x169   :  { %651 = vmatpush.msrb.mxu0 %v572_v0 }
 0x16a   :  { %540 = vmatpush.msrb.mxu2 %v354_v34  ;;  %560 = vmatpush.msrb.mxu3 %v355_v35 }
 0x16c   :  { %541 = vmatpush.msrb.mxu2 %v346_v38  ;;  %561 = vmatpush.msrb.mxu3 %v347_v39 }
 0x16e   :  { %542 = vmatpush.msrb.mxu2 %v338_v40  ;;  %562 = vmatpush.msrb.mxu3 %v339_v41 }
 0x170   :  { %543 = vmatpush.msrb.mxu2 %v330_v42  ;;  %563 = vmatpush.msrb.mxu3 %v331_v43 }
 0x171   :  { %741 = vmatmul.msk.f32.vlgmr.msrb.gmra.mxu2 %vm404_vm2, %v1030_v11  ;;  %742 = vmatmul.msk.f32.vlgmr.msrb.gmra.mxu3 %vm404_vm2, %v1030_v11  ;;  %v625_v11 = vld [vmem:[#allocation7 + $0x1a8] sm:$0xff] }
 0x172   :  { %676 = vmatpush.msra.mxu2 %v619_v44  ;;  %696 = vmatpush.msra.mxu3 %v635_v45 }
 0x174   :  { %677 = vmatpush.msra.mxu2 %v618_v46  ;;  %697 = vmatpush.msra.mxu3 %v634_v47 }
 0x176   :  { %678 = vmatpush.msra.mxu2 %v617_v50  ;;  %698 = vmatpush.msra.mxu3 %v633_v51 }
 0x178   :  { %679 = vmatpush.msra.mxu2 %v616_v54  ;;  %699 = vmatpush.msra.mxu3 %v632_v55 }
 0x17a   :  { %680 = vmatpush.msra.mxu2 %v615_v58  ;;  %700 = vmatpush.msra.mxu3 %v631_v59 }
 0x17c   :  { %681 = vmatpush.msra.mxu2 %v614_v62  ;;  %701 = vmatpush.msra.mxu3 %v630_v63 }
 0x17e   :  { %682 = vmatpush.msra.mxu2 %v613_v2  ;;  %702 = vmatpush.msra.mxu3 %v629_v3 }
 0x180   :  { %683 = vmatpush.msra.mxu2 %v612_v4  ;;  %703 = vmatpush.msra.mxu3 %v628_v5 }
 0x182   :  { %684 = vmatpush.msra.mxu2 %v611_v6  ;;  %704 = vmatpush.msra.mxu3 %v627_v7 }
 0x184   :  { %685 = vmatpush.msra.mxu2 %v610_v8  ;;  %705 = vmatpush.msra.mxu3 %v626_v9 }
 0x186   :  { %686 = vmatpush.msra.mxu2 %v609_v10  ;;  %706 = vmatpush.msra.mxu3 %v625_v11 }
 0x188   :  { %687 = vmatpush.msra.mxu2 %v608_v12  ;;  %707 = vmatpush.msra.mxu3 %v624_v13 }
 0x18a   :  { %688 = vmatpush.msra.mxu2 %v607_v14  ;;  %708 = vmatpush.msra.mxu3 %v623_v15 }
 0x18c   :  { %689 = vmatpush.msra.mxu2 %v606_v16  ;;  %709 = vmatpush.msra.mxu3 %v622_v17 }
 0x18e   :  { %690 = vmatpush.msra.mxu2 %v605_v18  ;;  %710 = vmatpush.msra.mxu3 %v621_v19 }
 0x190   :  { %691 = vmatpush.msra.mxu2 %v604_v20  ;;  %711 = vmatpush.msra.mxu3 %v620_v21 }
 0x1da   :  { %v505_v22 = vpop.f32.mrf.mxu0  ;;  %v525_v23 = vpop.f32.mrf.mxu1 }
 0x1df   :  { %v425_v24 = vpop.f32.mrf.mxu2  ;;  %v445_v25 = vpop.f32.mrf.mxu3 }
 0x1e0   :  { %v568_v26 = vmul.f32 %v505_v22, %v425_v24  ;;  %v569_v27 = vmul.f32 %v525_v23, %v445_v25 }
 0x1e2   :  { %652 = vmatmul.f32.vlgmr.msrb.gmra.mxu0 %v568_v26  ;;  %672 = vmatmul.f32.vlgmr.msrb.gmra.mxu1 %v569_v27 }
 0x1e8   :  { %v465_v28 = vpop.f32.mrf.mxu2  ;;  %v485_v29 = vpop.f32.mrf.mxu3 }
 0x1f4   :  { %v545_v30 = vpop.f32.mrf.mxu2  ;;  %v565_v31 = vpop.f32.mrf.mxu3 }
 0x1f5   :  { %v570_v32 = vmul.f32 %v545_v30, %v465_v28  ;;  %v571_v33 = vmul.f32 %v565_v31, %v485_v29 }
 0x1f7   :  { %692 = vmatmul.f32.vlgmr.msra.gmra.mxu2 %v570_v32  ;;  %712 = vmatmul.f32.vlgmr.msra.gmra.mxu3 %v571_v33 }
 0x25f   :  { %v653_v34 = vpop.f32.mrf.mxu0  ;;  %v673_v35 = vpop.f32.mrf.mxu1 }
 0x260   :  { %v674_v36 = vadd.f32 %v673_v35, %v653_v34 }
 0x27a   :  { %v693_v37 = vpop.f32.mrf.mxu2  ;;  %v713_v39 = vpop.f32.mrf.mxu3 }
 0x27b   :  { %v694_v38 = vadd.f32 %v693_v37, %v674_v36 }
 0x27d   :  { %v714_v40 = vadd.f32 %v713_v39, %v694_v38 }
 0x27f   :  { %716 = vst [vmem:[#allocation8] sm:$0x1] %v714_v40 }
 0x280   :  { %727 = dma.vmem_to_hbm [thread:$0]  %s723_s11, 16, %s725_s14, [#allocation4]  }
 0x281   :  { %861 = dma.done.wait [#allocation4], 16  }
 0x282   :  { %862 = vsyncadd [#allocation4], 4294967280 }
 0x283   :  { %732 = vsyncpa [#allocation3], 1 }
 0x284   :  { %733 = vsyncpa [#allocation6], 1 }
 0x285   :  { %734 = vsyncpa [#allocation4], 1 }

</bundles_post_ra>
